<compile_context>
chip_gen: v7x
topology: tpu7x:2x2x1
jax: 0.10.0
libtpu: 0.0.40
codegen_flags: <defaults>
</compile_context>

<pallas_src>
import functools

import jax
import jax.numpy as jnp
from jax.experimental import pallas as pl
from jax.experimental.pallas import tpu as pltpu


def _gated_causal_conv_kernel(x_ref, w_ref, b_ref, o_ref, *, K, dil, T, C_out):
    """One batch element per grid step, time-in-lanes layout.

    x_ref : (1, C_in, T + (K-1)*dil)  causally left-padded input (NCT)
    w_ref : (2*C_out, K*C_in)         fused gate weights, column = k*C_in + ci
    b_ref : (2*C_out, 1)              fused biases
    o_ref : (1, C_out, T)             gated output (NCT)
    """
    x = x_ref[0]  # (C_in, T_pad), lanes carry time

    # im2col: the K shifted windows are built ONCE (shared by both branches)
    # and stacked along the small sublane axis.  Tap k reads the window that
    # starts at lane offset k*dil of the left-padded signal, which is exactly
    # y[t] += w[:, :, k] @ x[:, t - (K-1-k)*dil] in unpadded coordinates.
    slab = jnp.concatenate(
        [x[:, k * dil:k * dil + T] for k in range(K)], axis=0)  # (K*C_in, T)

    # Single fused MXU matmul for both gate branches, f32 accumulation.
    acc = jnp.dot(w_ref[...], slab, preferred_element_type=jnp.float32)
    acc = acc + b_ref[...]           # (2*C_out, 1) broadcasts over time lanes

    # Rows [0, C_out) -> sigmoid branch, rows [C_out, 2*C_out) -> tanh branch.
    gate = jax.nn.sigmoid(acc[:C_out, :]) * jnp.tanh(acc[C_out:, :])
    o_ref[0] = gate.astype(o_ref.dtype)


def causal_gated_conv1d(x_nct, w1, b1, w2, b2, dilation):
    """x_nct: (N, C_in, T); w*: (C_out, C_in, K) PyTorch Conv1d layout; b*: (C_out,)."""
    N, C_in, T = x_nct.shape
    C_out, _, K = w1.shape
    pad = (K - 1) * dilation
    T_pad = T + pad

    # Glue: causal left-pad on the time axis; fuse the two branches' weights
    # into one (2*C_out, K*C_in) matrix whose column index is k*C_in + ci
    # (matching the im2col slab row order), and the biases into (2*C_out, 1).
    x_pad = jnp.pad(x_nct, ((0, 0), (0, 0), (pad, 0)))
    w1r = jnp.transpose(w1, (0, 2, 1)).reshape(C_out, K * C_in)
    w2r = jnp.transpose(w2, (0, 2, 1)).reshape(C_out, K * C_in)
    w_fused = jnp.concatenate([w1r, w2r], axis=0)            # (2*C_out, K*C_in)
    b_fused = jnp.concatenate([b1, b2]).reshape(2 * C_out, 1)

    kernel = functools.partial(_gated_causal_conv_kernel,
                               K=K, dil=dilation, T=T, C_out=C_out)

    # TODO(synk): for very long sequences (v7x 64 MiB VMEM) add a time-tile
    # grid axis with a (K-1)*dilation halo (Element-indexed or manual DMA);
    # at SwishNet-scale T the whole (C_in, T_pad) row fits VMEM comfortably.
    out_nct = pl.pallas_call(
        kernel,
        out_shape=jax.ShapeDtypeStruct((N, C_out, T), x_nct.dtype),
        grid=(N,),
        in_specs=[
            pl.BlockSpec((1, C_in, T_pad), lambda n: (n, 0, 0)),
            pl.BlockSpec((2 * C_out, K * C_in), lambda n: (0, 0)),
            pl.BlockSpec((2 * C_out, 1), lambda n: (0, 0)),
        ],
        out_specs=pl.BlockSpec((1, C_out, T), lambda n: (n, 0, 0)),
        compiler_params=pltpu.CompilerParams(
            dimension_semantics=("parallel",)),   # batch axis -> both v7x TCs
    )(x_pad, w_fused, b_fused)

    return out_nct  # already NCT, no transpose needed


def _reference(x_nct, w1, b1, w2, b2, dilation):
    """Pure-JAX reference mirroring the PyTorch CausalGatedConv1D forward."""
    K = w1.shape[2]
    pad = (K - 1) * dilation
    xp = jnp.pad(x_nct, ((0, 0), (0, 0), (pad, 0)))
    dn = ('NCH', 'OIH', 'NCH')
    y1 = jax.lax.conv_general_dilated(
        xp, w1, window_strides=(1,), padding='VALID',
        rhs_dilation=(dilation,), dimension_numbers=dn) + b1[None, :, None]
    y2 = jax.lax.conv_general_dilated(
        xp, w2, window_strides=(1,), padding='VALID',
        rhs_dilation=(dilation,), dimension_numbers=dn) + b2[None, :, None]
    return jax.nn.sigmoid(y1) * jnp.tanh(y2)


if __name__ == "__main__":
    # Small shapes consistent with the module: in_channels=4, filters=16
    # (-> 8 output channels per branch), kernel length=6, dilation(strides)=1.
    N, C_in, T = 2, 4, 16
    filters, length, strides = 16, 6, 1
    C_out = filters // 2

    key = jax.random.PRNGKey(0)
    kx, kw1, kb1, kw2, kb2 = jax.random.split(key, 5)

    # Deterministic synthetic parameters (PyTorch Conv1d shapes: (O, I, K), (O,)).
    bound = 1.0 / (C_in * length) ** 0.5
    x = jax.random.normal(kx, (N, C_in, T), dtype=jnp.float32)
    w1 = jax.random.uniform(kw1, (C_out, C_in, length), jnp.float32, -bound, bound)
    b1 = jax.random.uniform(kb1, (C_out,), jnp.float32, -bound, bound)
    w2 = jax.random.uniform(kw2, (C_out, C_in, length), jnp.float32, -bound, bound)
    b2 = jax.random.uniform(kb2, (C_out,), jnp.float32, -bound, bound)

    out = causal_gated_conv1d(x, w1, b1, w2, b2, strides)
    out = jax.block_until_ready(out)

    ref = _reference(x, w1, b1, w2, b2, strides)
    assert out.shape == (N, C_out, T), out.shape
    assert jnp.allclose(out, ref, atol=1e-5, rtol=1e-5), "mismatch vs reference"

    print("KERNEL_OK")
</pallas_src>

<mosaic_0001>
module attributes {stable_mosaic.version = 11 : i64} {
  func.func @_gated_causal_conv_kernel(%arg0: i32, %arg1: memref<1x4x21xf32, #tpu.memory_space<vmem>>, %arg2: memref<16x24xf32, #tpu.memory_space<vmem>>, %arg3: memref<16x1xf32, #tpu.memory_space<vmem>>, %arg4: memref<1x8x16xf32, #tpu.memory_space<vmem>>) attributes {dimension_semantics = [#tpu.dimension_semantics<parallel>], iteration_bounds = array<i64: 2>, scalar_prefetch = 0 : i64, scratch_operands = 0 : i64, tpu.core_type = #tpu.core_type<tc>, window_params = [{transform_indices = @transform_0, window_bounds = array<i64: 1, 4, 21>}, {pipeline_mode = #tpu.pipeline_mode<synchronous>, transform_indices = @transform_1, window_bounds = array<i64: 16, 24>}, {pipeline_mode = #tpu.pipeline_mode<synchronous>, transform_indices = @transform_2, window_bounds = array<i64: 16, 1>}, {transform_indices = @transform_3, window_bounds = array<i64: 1, 8, 16>}]} {
    %c0 = arith.constant 0 : index
    %c0_0 = arith.constant 0 : index
    %c0_1 = arith.constant 0 : index
    %0 = vector.load %arg1[%c0, %c0_0, %c0_1] : memref<1x4x21xf32, #tpu.memory_space<vmem>>, vector<1x4x21xf32>
    %1 = vector.shape_cast %0 : vector<1x4x21xf32> to vector<4x21xf32>
    %2 = vector.extract_strided_slice %1 {offsets = [0, 0], sizes = [4, 16], strides = [1, 1]} : vector<4x21xf32> to vector<4x16xf32>
    %3 = vector.extract_strided_slice %1 {offsets = [0, 1], sizes = [4, 16], strides = [1, 1]} : vector<4x21xf32> to vector<4x16xf32>
    %4 = vector.extract_strided_slice %1 {offsets = [0, 2], sizes = [4, 16], strides = [1, 1]} : vector<4x21xf32> to vector<4x16xf32>
    %5 = vector.extract_strided_slice %1 {offsets = [0, 3], sizes = [4, 16], strides = [1, 1]} : vector<4x21xf32> to vector<4x16xf32>
    %6 = vector.extract_strided_slice %1 {offsets = [0, 4], sizes = [4, 16], strides = [1, 1]} : vector<4x21xf32> to vector<4x16xf32>
    %7 = vector.extract_strided_slice %1 {offsets = [0, 5], sizes = [4, 16], strides = [1, 1]} : vector<4x21xf32> to vector<4x16xf32>
    %8 = tpu.concatenate %2, %3, %4, %5, %6, %7 in 0 : vector<4x16xf32>, vector<4x16xf32>, vector<4x16xf32>, vector<4x16xf32>, vector<4x16xf32>, vector<4x16xf32> -> vector<24x16xf32>
    %c0_2 = arith.constant 0 : index
    %c0_3 = arith.constant 0 : index
    %9 = vector.load %arg2[%c0_2, %c0_3] : memref<16x24xf32, #tpu.memory_space<vmem>>, vector<16x24xf32>
    %cst = arith.constant dense<0.000000e+00> : vector<16x16xf32>
    %10 = tpu.matmul %9, %8, %cst {dimension_numbers = #tpu.dot_dimension_numbers<[1], [0], [0], [1], [0, 0, 1, 1], [], []>} : vector<16x24xf32>, vector<24x16xf32>, vector<16x16xf32> -> vector<16x16xf32>
    %c0_4 = arith.constant 0 : index
    %c0_5 = arith.constant 0 : index
    %11 = vector.load %arg3[%c0_4, %c0_5] : memref<16x1xf32, #tpu.memory_space<vmem>>, vector<16x1xf32>
    %12 = vector.broadcast %11 : vector<16x1xf32> to vector<16x16xf32>
    %13 = arith.addf %10, %12 : vector<16x16xf32>
    %14 = vector.extract_strided_slice %13 {offsets = [0, 0], sizes = [8, 16], strides = [1, 1]} : vector<16x16xf32> to vector<8x16xf32>
    %15 = arith.negf %14 : vector<8x16xf32>
    %16 = math.exp %15 : vector<8x16xf32>
    %cst_6 = arith.constant 1.000000e+00 : f32
    %17 = vector.broadcast %cst_6 : f32 to vector<8x16xf32>
    %18 = arith.addf %17, %16 : vector<8x16xf32>
    %19 = arith.divf %17, %18 : vector<8x16xf32>
    %20 = vector.extract_strided_slice %13 {offsets = [8, 0], sizes = [8, 16], strides = [1, 1]} : vector<16x16xf32> to vector<8x16xf32>
    %21 = math.tanh %20 : vector<8x16xf32>
    %22 = arith.mulf %19, %21 : vector<8x16xf32>
    %c0_7 = arith.constant 0 : index
    %c0_8 = arith.constant 0 : index
    %c0_9 = arith.constant 0 : index
    %23 = vector.load %arg4[%c0_7, %c0_8, %c0_9] : memref<1x8x16xf32, #tpu.memory_space<vmem>>, vector<1x8x16xf32>
    %24 = vector.shape_cast %23 : vector<1x8x16xf32> to vector<8x16xf32>
    %25 = vector.shape_cast %22 : vector<8x16xf32> to vector<1x8x16xf32>
    tpu.vector_store %arg4[%c0_7, %c0_8, %c0_9], %25 {strides = array<i32>} : memref<1x8x16xf32, #tpu.memory_space<vmem>>, vector<1x8x16xf32>,
    return
  }
  func.func @transform_0(%arg0: i32) -> (i32, i32, i32) {
    %c0_i32 = arith.constant 0 : i32
    %c0_i32_0 = arith.constant 0 : i32
    %c0_i32_1 = arith.constant 0 : i32
    return %arg0, %c0_i32, %c0_i32_0 : i32, i32, i32
  }
  func.func @transform_1(%arg0: i32) -> (i32, i32) {
    %c0_i32 = arith.constant 0 : i32
    %c0_i32_0 = arith.constant 0 : i32
    %c0_i32_1 = arith.constant 0 : i32
    return %c0_i32, %c0_i32_0 : i32, i32
  }
  func.func @transform_2(%arg0: i32) -> (i32, i32) {
    %c0_i32 = arith.constant 0 : i32
    %c0_i32_0 = arith.constant 0 : i32
    %c0_i32_1 = arith.constant 0 : i32
    return %c0_i32, %c0_i32_0 : i32, i32
  }
  func.func @transform_3(%arg0: i32) -> (i32, i32, i32) {
    %c0_i32 = arith.constant 0 : i32
    %c0_i32_0 = arith.constant 0 : i32
    %c0_i32_1 = arith.constant 0 : i32
    return %arg0, %c0_i32, %c0_i32_0 : i32, i32, i32
  }
}

</mosaic_0001>

<bundles_post_ra>
// kernel: tpu_custom_call.1
= control target key start
LH: loop header
LB: loop body
LE: loop exit
PB: predicated region body
PF: predicated region fallthrough
CT: control target
= control target key end

     0   :  { %8 = vsyncpa [#allocation3], 0  ;;  %s793_s0 = inlined_call_operand.hbm [shape: f32[2,4,21], index: 0, kind: input, shape index: {}]   ;;  %s794_s1 = inlined_call_operand.vmem [shape: f32[16,24], index: 1, kind: input, shape index: {}]   ;;  %s795_s2 = inlined_call_operand.vmem [shape: f32[16,1], index: 2, kind: input, shape index: {}]   ;;  %s796_s3 = inlined_call_operand.hbm [shape: f32[2,8,16], index: 3, kind: output, shape index: {}]  }
   0x1   :  { %10 = vsyncpa [#allocation3 + $0x1], 0 }
   0x2   :  { %11 = vsyncpa [#allocation4], 0 }
   0x3   :  { %13 = vsyncpa [#allocation4 + $0x1], 0  ;;  %s617_s12 = smov 0   ;;  %s619_s13 = smov 0  }
   0x4   :  { %s621_s14 = smov 0   ;;  %s623_s15 = smov 0  }
   0x5 LB: > { %s638_s16 = sadd.s32 4294967295, %s587_s15   ;;  %s398_s17 = sadd.s32 4294967294, %s587_s15   ;;  %s587_s15 = sphi %s623_s15, %s811_s15   ;;  %s583_s14 = sphi %s621_s14, %s810_s14   ;;  %s579_s13 = sphi %s619_s13, %s809_s13   ;;  %s575_s12 = sphi %s617_s12, %s808_s12  }
   0x6   : > { %s642_s18 = sadd.s32 1, %s587_s15   ;;  %s26_s19 = sadd.s32 1, %s583_s14 }
   0x7   : > { %s23_s20 = ssub.s32 %s587_s15, %s642_s18  ;;  %p33_p0 = scmp.ne.s32.totalorder %s583_s14, %s579_s13 }
   0x8   : > { %p24_p1 = scmp.eq.s32.totalorder %s23_s20, 0  ;;  %p34_p2 = scmp.eq.s32.totalorder %s587_s15, 0 }
   0x9   : > { %p39_p3 = scmp.ne.s32.totalorder %s579_s13, %s575_s12  ;;  %p40_p4 = scmp.eq.s32.totalorder %s638_s16, 0 }
   0xa   : > { %s654_s21 = scalar_select %p24_p1, %s583_s14, %s26_s19  }
   0xb   : > { %p656_p5 = por %p34_p2, %p33_p0  ;;  %p660_p6 = por %p40_p4, %p39_p3 }
   0xc   : > { %p105_p7 = scmp.eq.s32.totalorder %s638_s16, 1  ;;  %p111_p8 = scmp.eq.s32.totalorder %s398_s17, 1 }
   0xd   : > { %p443_p10 = scmp.lt.s32.totalorder %s587_s15, 2  ;;  %s137_s26 = sand.u32 1, %s583_s14  }
   0xe   : > { %p667_p11 = por %p105_p7, %p33_p0  ;;  %p671_p12 = por %p111_p8, %p39_p3 }
   0xf   : > { %s402_s27 = sshll.u32 %s587_s15, 6  ;;  %s401_s28 = sshll.u32 %s137_s26, 2 }
  0x10   : > { %s800_s24 = scalar_select %p667_p11, 1, 0 }
  0x11   : > { %s801_s25 = scalar_select %p671_p12, 1, 0 }
  0x12   : > { %s680_s4 = scalar_lea.hbm %s793_s0, %s402_s27  ;;  %s141_s5 = scalar_lea.vmem [#allocation2], %s401_s28 }
  0x13   : > { %s148_s6 = sshll.u32 %s141_s5, 4  ;;  %p684_p13 = pnand %p443_p10, %p656_p5  ;;  %s688_s6 = int_to_ptr.vmem [resolvable:$true] %s148_s6 }
  0x14   : > { %s138_s8 = scalar_lea.sflag [#allocation3], %s137_s26  ;;  %s491_s9 = scalar_lea.hbm %s680_s4, 64 }
  0x15   : > { %p492_p2 = scmp.ne.s32.totalorder %s680_s4, %s491_s9  ;;  %p493_p3 = pneg %p684_p13 }
  0x16   : > { %s496_s17 = scalar_lea.hbm %s793_s0, 128  ;;  %p497_p5 = scmp.lt.u32.totalorder %s680_s4, %s793_s0 }
  0x17   : > { %p494_p4 = pnand %p493_p3, %p492_p2  ;;  %p498_p8 = scmp.lt.u32.totalorder %s496_s17, %s491_s9 }
  0x18   : > { %p500_p9 = scmp.lt.u32.totalorder %s491_s9, %s680_s4 }
  0x19   : > { %p495_p7 = pneg %p494_p4  ;;  %p499_p10 = por %p498_p8, %p497_p5 }
  0x1b   : > { %p501_p0 = por %p500_p9, %p499_p10 }
  0x1d   : > { %p502_p1 = pnand %p501_p0, %p495_p7 }
  0x1f   : > { %505 = shalt.err (!%p502_p1)
}
  0x20   : > { %s506_s22 = scalar_lea.vmem %s688_s6, 64  ;;  %s589_s26 = smov [#allocation2]  }
  0x21   : > { %p507_p2 = scmp.ne.s32.totalorder %s688_s6, %s506_s22  ;;  %s511_s27 = sshll.u32 %s589_s26, 4  ;;  %s512_s27 = int_to_ptr.vmem [resolvable:$false] %s511_s27 }
  0x22   : > { %s513_s28 = scalar_lea.vmem %s512_s27, 128  ;;  %p514_p11 = scmp.lt.s32.totalorder %s688_s6, %s512_s27 }
  0x23   : > { %p509_p4 = pnand %p507_p2, %p493_p3  ;;  %p515_p5 = scmp.lt.s32.totalorder %s513_s28, %s506_s22 }
  0x25   : > { %p510_p12 = pneg %p509_p4  ;;  %p516_p8 = por %p515_p5, %p514_p11 }
  0x27   : > { %p517_p9 = pnand %p516_p8, %p510_p12 }
  0x29   : > { %520 = shalt.err (!%p517_p9)
}
  0x2a   : > { %438 = dma.hbm_to_vmem [thread:$0]  (!%p684_p13), %s680_s4, 64, %s688_s6, %s138_s8  }
  0x2b   : > { %p803_p0 = scmp.lt.s32.totalorder %s587_s15, 3  ;;  %p804_p1 = scmp.ge.s32.totalorder %s587_s15, 1 }
  0x2d   : > { %p154_p3 = pnand %p804_p1, %p803_p0 }
  0x2e   : > { %s722_s29 = sand.u32 (!%p154_p3), 1, %s579_s13  }
  0x2f   : > { %157 = sbr.rel (%p154_p3) target bundleno = 443 (0x1bb), region = 32  ;;  %s404_s30 = sshll.u32 (!%p154_p3), %s722_s29, 2 }
  0x30   : > { %s160_s5 = scalar_lea.sflag (!%p154_p3), [#allocation3], %s722_s29  ;;  %s163_s9 = scalar_lea.vmem (!%p154_p3), [#allocation2], %s404_s30 }
  0x36   : > { %566 = dma.done.wait (%p660_p6), %s160_s5, 64  }
  0x37   : > { %568 = vsyncadd (%p660_p6), %s160_s5, 4294967232  ;;  %v186_v0 = vld [vmem:[%s163_s9] sm:$0xf]  ;;  %vm222_vm0 = vcmask 195584   ;;  %s590_s7 = smov 127   ;;  %s591_s8 = smov 125  }
  0x38   : > { %v188_v1 = vrot.slane %v186_v0, 4  ;;  %v208_v2 = vld [vmem:[%s794_s1] sm:$0xff]  ;;  %v592_v3 = vmov 0   ;;  %s593_s10 = smov 126   ;;  %s594_s23 = smov 124   ;;  %v211_v5 = vld [vmem:[%s795_s2 + $0x8] sm:$0xff] }
  0x39   : > { %424 = vmatprep.mubr.msk.f32.mxu0 %vm222_vm0, %v208_v2  ;;  %484 = vset.pattern.permute.xlu0 %v592_v3  ;;  %v210_v4 = vld [vmem:[%s795_s2] sm:$0xff]  ;;  %s595_s19 = smov 123   ;;  %vm204_vm1 = vcmask 1043456   ;;  %v209_v15 = vld [vmem:[%s794_s1 + $0x8] sm:$0xff]  ;;  %s405_s28 = sshll.u32 %s722_s29, 3  ;;  %vm312_vm2 = vcmask 130048  }
  0x3a   : > { %189 = vrot.lane.b32.xlu0 %v188_v1, %s590_s7  ;;  %195 = vrot.lane.b32.xlu1 %v188_v1, %s591_s8  ;;  %s410_s30 = sshll.u32 %s638_s16, 7  ;;  %s185_s5 = scalar_lea.vmem [#allocation5], %s405_s28 }
  0x3b   : > { %483 = vset.pattern.permute.xlu1 %v592_v3  ;;  %s328_s9 = sshll.u32 %s185_s5, 4  ;;  %s749_s7 = scalar_lea.hbm %s796_s3, %s410_s30  ;;  %s751_s9 = int_to_ptr.vmem [resolvable:$true] %s328_s9 }
  0x3c   : > { %s315_s8 = scalar_lea.sflag [#allocation4], %s722_s29  ;;  %p805_p11 = scmp.ne.s32.totalorder %s800_s24, 0 }
  0x3d   : > { %s596_s16 = smov [#allocation5]  }
  0x3e   : > { %192 = vrot.lane.b32.xlu0 %v186_v0, %s593_s10  ;;  %198 = vrot.lane.b32.xlu1 %v186_v0, %s594_s23  ;;  %s521_s10 = scalar_lea.vmem %s751_s9, 128  ;;  %s525_s23 = sshll.u32 %s596_s16, 4  ;;  %s526_s23 = int_to_ptr.vmem [resolvable:$false] %s525_s23 }
  0x3f   : > { %p522_p6 = scmp.ne.s32.totalorder %s751_s9, %s521_s10  ;;  %s527_s11 = scalar_lea.vmem %s526_s23, 256 }
  0x40   : > { %p528_p7 = scmp.lt.s32.totalorder %s751_s9, %s526_s23  ;;  %p529_p10 = scmp.lt.s32.totalorder %s527_s11, %s521_s10 }
  0x41   : > { %p523_p12 = pnand %p522_p6, %p805_p11 }
  0x42   : > { %201 = vrot.lane.b32.xlu0 %v188_v1, %s595_s19  ;;  %214 = vperm.xlu1 %483, %v210_v4   ;;  %p530_p2 = por %p529_p10, %p528_p7 }
  0x43   : > { %p524_p13 = pneg %p523_p12 }
  0x45   : > { %p531_p4 = pnand %p530_p2, %p524_p13 }
  0x46   : > { %219 = vperm.xlu0 %484, %v211_v5  }
  0xac   : > { %v190_v6 = vpop.permute.xlu0 %189  ;;  %v196_v7 = vpop.permute.xlu1 %195 }
  0xad   : > { %v205_v9 = vsel %vm204_vm1, %v186_v0, %v190_v6 }
  0xb0   : > { %v193_v8 = vpop.permute.xlu0 %192  ;;  %v199_v12 = vpop.permute.xlu1 %198 }
  0xb1   : > { %v206_v10 = vsel %vm204_vm1, %v193_v8, %v196_v7 }
  0xb2   : > { %v427_v11 = vpack.c.bf16 %v206_v10, %v205_v9 }
  0xb4   : > { %428 = vmatprep.subr.bf16.mxu0 %v427_v11  ;;  %v202_v13 = vpop.permute.xlu0 %201 }
  0xb5   : > { %430 = vmatpush3.bf16.msra.mxu0 %v427_v11  ;;  %v207_v14 = vsel %vm204_vm1, %v199_v12, %v202_v13 }
  0xb6   : > { %422 = vmatprep.subr.mxu0 %v207_v14 }
  0xb9   : > { %423 = vmatpush3.msra.mxu0 %v207_v14 }
  0xba   : > { %425 = vmatmul.mubr.msk.f32.vlgmr.msra.gmra.mrb[0].mxu0 %vm222_vm0, %v209_v15 }
  0xc1   : > { %v215_v16 = vpop.permute.xlu1 %214 }
  0xc5   : > { %v220_v21 = vpop.permute.xlu0 %219 }
 0x18d   : > { %v426_v17 = vpop.f32.mrb[0].mxu0 }
 0x18e   : > { %v295_v18 = vpop.f32.mrb[1].mxu0  ;;  %v301_v22 = vadd.f32 %v426_v17, %v220_v21 }
 0x18f   : > { %v296_v19 = vadd.f32 %v295_v18, %v215_v16 }
 0x191   : > { %v408_v20 = vmul.f32 -1.442695, %v296_v19 }
 0x193   : > { %485 = vpow2.f32 %v408_v20 }
 0x194   : > { %487 = vtanh.f32 %v301_v22 }
 0x19d   : > { %v486_v23 = vpop.eup %485 }
 0x19e   : > { %v307_v24 = vadd.f32 1.0, %v486_v23  ;;  %v488_v25 = vpop.eup %487 }
 0x1a0   : > { %489 = vrcp.f32 %v307_v24 }
 0x1aa   : > { %v490_v26 = vpop.eup %489 }
 0x1ab   : > { %v311_v27 = vmul.f32 %v490_v26, %v488_v25 }
 0x1ad   : > { %313 = vst.msk [vmem:[%s185_s5] sm:$0xff] %vm312_vm2, %v311_v27 }
 0x1ae   : > { %534 = shalt.err (!%p531_p4)
}
 0x1af   : > { %s535_s29 = scalar_lea.hbm %s749_s7, 128  ;;  %s539_s20 = scalar_lea.hbm %s796_s3, 256 }
 0x1b0   : > { %p536_p5 = scmp.ne.s32.totalorder %s749_s7, %s535_s29  ;;  %p540_p0 = scmp.lt.u32.totalorder %s749_s7, %s796_s3 }
 0x1b1   : > { %p541_p1 = scmp.lt.u32.totalorder %s539_s20, %s535_s29  ;;  %p543_p6 = scmp.lt.u32.totalorder %s535_s29, %s749_s7 }
 0x1b2   : > { %p537_p8 = pnand %p536_p5, %p805_p11 }
 0x1b3   : > { %p542_p3 = por %p541_p1, %p540_p0 }
 0x1b4   : > { %p538_p9 = pneg %p537_p8 }
 0x1b5   : > { %p544_p12 = por %p543_p6, %p542_p3 }
 0x1b7   : > { %p545_p13 = pnand %p544_p12, %p538_p9 }
 0x1b9   : > { %548 = shalt.err (!%p545_p13)
}
 0x1ba   : > { %433 = dma.vmem_to_hbm [thread:$0]  (%p805_p11), %s751_s9, 128, %s749_s7, %s315_s8  }
 0x1bb PF: > { %s340_s27 = sand.u32 1, %s575_s12   ;;  %p806_p7 = scmp.ne.s32.totalorder %s801_s25, 0 }
 0x1bc   : > { %p807_p10 = scmp.ge.s32.totalorder %s587_s15, 2  ;;  %s341_s28 = scalar_lea.sflag [#allocation4], %s340_s27 }
 0x1be   : > { %p440_p2 = pnand %p807_p10, %p806_p7 }
 0x1c0   : > { %570 = dma.done.wait (!%p440_p2), %s341_s28, 128  }
 0x1c1   : > { %572 = vsyncadd (!%p440_p2), %s341_s28, 4294967168  ;;  %p16_p4 = scmp.ge.s32.totalorder %s642_s18, 4   ;;  %s808_s12 = smov %s579_s13 }
 0x1c2   : > { %s809_s13 = smov %s583_s14  ;;  %s810_s14 = smov %s654_s21 }
 0x1c3   : > { %s811_s15 = smov %s642_s18  ;;  %18 = sbr.rel (!%p16_p4) target bundleno = 5 (0x5), region = 77 }
 0x1ca   :  { %346 = vsyncpa [#allocation3], 1 }
 0x1cb   :  { %348 = vsyncpa [#allocation3 + $0x1], 1 }
 0x1cc   :  { %349 = vsyncpa [#allocation4], 1 }
 0x1cd   :  { %351 = vsyncpa [#allocation4 + $0x1], 1 }

</bundles_post_ra>
